<compile_context>
chip_gen: v6e
topology: v6e:2x2x1
jax: 0.10.0
libtpu: 0.0.40
codegen_flags: <defaults>
</compile_context>

<pallas_src>
import functools

import jax
import jax.numpy as jnp
from jax.experimental import pallas as pl
from jax.experimental.pallas import tpu as pltpu

_SMALL_BATCH = 32       # actor-step path: plain XLA beats a 1-step Pallas grid
_MIN_TILE_B = 256
_MAX_TILE_B = 2048


def ppo_kernel(x_ref, w1_ref, b1_ref, w2_ref, b2_ref, wh_ref, bh_ref,
               out_ref, *, num_actions):
    """Fused PPO forward on one batch tile.

    Output layout is transposed: lanes = batch, sublanes = head outputs.
      rows [0, A) : softmax policy probabilities
      row   A     : value head output
    """
    x = x_ref[...]                                                   # [tb, D]

    # shared trunk: Linear -> ReLU -> Linear -> ReLU
    h = jnp.dot(x, w1_ref[...], preferred_element_type=jnp.float32) + b1_ref[...]
    h = jnp.maximum(h, 0.0)
    h = jnp.dot(h, w2_ref[...], preferred_element_type=jnp.float32) + b2_ref[...]
    h = jnp.maximum(h, 0.0)                                          # [tb, H]

    # fused policy+value head, produced directly in transposed layout:
    #   (A+1, H) x (tb, H)^T -> (A+1, tb)   (one MXU pass, no data transpose)
    head_t = jax.lax.dot_general(
        wh_ref[...], h,
        dimension_numbers=(((1,), (1,)), ((), ())),
        preferred_element_type=jnp.float32) + bh_ref[...]            # [A+1, tb]

    row = jax.lax.broadcasted_iota(jnp.int32, head_t.shape, 0)       # sublane idx
    is_policy = row < num_actions

    # masked, max-stabilized softmax over the A policy sublanes only.
    logits = jnp.where(is_policy, head_t, -jnp.inf)
    m = jnp.max(logits, axis=0, keepdims=True)                       # [1, tb]
    e = jnp.exp(logits - m)                     # value row -> exp(-inf) = 0
    denom = jnp.sum(e, axis=0, keepdims=True)                        # [1, tb]
    probs = e / denom                           # exact divide: huge VPU/EUP slack

    # single lane-dense (A+1, tb) store: probs in policy rows, raw head in row A.
    out_ref[...] = jnp.where(row == num_actions, head_t, probs)


def prepare_params(p):
    """One-time conversion of PyTorch-layout params to kernel layout.

    * trunk weights transposed to (in, out); biases made 2-D rows
    * policy + value heads stacked into one (A+1, H) output-major slab (this
      IS the PyTorch layout, so no transpose) plus an (A+1, 1) bias column.
    Call once at parameter-load time, NOT per forward call.
    """
    A, _ = p["wp"].shape
    wh_t = jnp.concatenate([p["wp"], p["wv"]], axis=0)               # (A+1, H)
    bh_t = jnp.concatenate([p["bp"], p["bv"]])[:, None]              # (A+1, 1)
    return dict(
        w1=p["w1"].T, b1=p["b1"][None, :],
        w2=p["w2"].T, b2=p["b2"][None, :],
        wh_t=wh_t, bh_t=bh_t,
        num_actions=int(A),
    )


def _pick_tile_b(b):
    # Big tiles amortize the ~0.35us per-grid-step overhead; prefer >=2 grid
    # steps so both TensorCores (each with its own HBM path) are used on v7x.
    half = pl.cdiv(pl.cdiv(b, 2), 128) * 128
    return int(min(_MAX_TILE_B, max(_MIN_TILE_B, half)))


def _xla_forward(x, kp):
    """Plain XLA path for tiny (actor-step) batches."""
    h = jnp.maximum(x @ kp["w1"] + kp["b1"], 0.0)
    h = jnp.maximum(h @ kp["w2"] + kp["b2"], 0.0)
    head = h @ kp["wh_t"].T + kp["bh_t"][:, 0]
    A = kp["num_actions"]
    policy = jax.nn.softmax(head[:, :A], axis=-1)
    value = head[:, A:A + 1]
    return policy, value


def ppo_forward(x, kp):
    """x: [B, input_dim] f32. kp: kernel-layout params from prepare_params()."""
    B, D = x.shape
    A = kp["num_actions"]

    if B <= _SMALL_BATCH:
        return _xla_forward(x, kp)

    tile_b = _pick_tile_b(B)
    b_pad = pl.cdiv(B, tile_b) * tile_b
    if b_pad != B:
        x = jnp.pad(x, ((0, b_pad - B), (0, 0)))

    weights = (kp["w1"], kp["b1"], kp["w2"], kp["b2"], kp["wh_t"], kp["bh_t"])
    resident = lambda a: pl.BlockSpec(a.shape, lambda i: (0,) * a.ndim)

    out = pl.pallas_call(
        functools.partial(ppo_kernel, num_actions=A),
        out_shape=jax.ShapeDtypeStruct((A + 1, b_pad), jnp.float32),
        grid=(b_pad // tile_b,),
        in_specs=[pl.BlockSpec((tile_b, D), lambda i: (i, 0))]
                 + [resident(w) for w in weights],
        # transposed, lane-dense output: sublane dim (A+1) equals the full
        # array dim (exempt from 8-divisibility); lane dim is a multiple of 128.
        out_specs=pl.BlockSpec((A + 1, tile_b), lambda i: (0, i)),
        compiler_params=pltpu.CompilerParams(
            dimension_semantics=("parallel",)),   # 2nd TC on v7x; no-op v5e/v6e
    )(x, *weights)

    policy = out[:A, :B].T            # tiny (A+1, B) slab: cheap wrapper fixup
    value = out[A, :B][:, None]
    return policy, value


def init_params(key, input_dim, hidden_dim, output_dim):
    """Deterministic synthetic init, PyTorch Linear layout: W is (out, in)."""
    ks = jax.random.split(key, 8)

    def lin(kw, kb, fan_in, fan_out):
        bound = 1.0 / jnp.sqrt(fan_in)
        w = jax.random.uniform(kw, (fan_out, fan_in), jnp.float32, -bound, bound)
        b = jax.random.uniform(kb, (fan_out,), jnp.float32, -bound, bound)
        return w, b

    w1, b1 = lin(ks[0], ks[1], input_dim, hidden_dim)
    w2, b2 = lin(ks[2], ks[3], hidden_dim, hidden_dim)
    wp, bp = lin(ks[4], ks[5], hidden_dim, output_dim)
    wv, bv = lin(ks[6], ks[7], hidden_dim, 1)
    return dict(w1=w1, b1=b1, w2=w2, b2=b2, wp=wp, bp=bp, wv=wv, bv=bv)


def reference_forward(x, p):
    h = jnp.maximum(x @ p["w1"].T + p["b1"], 0.0)
    h = jnp.maximum(h @ p["w2"].T + p["b2"], 0.0)
    logits = h @ p["wp"].T + p["bp"]
    policy = jax.nn.softmax(logits, axis=-1)
    value = h @ p["wv"].T + p["bv"]
    return policy, value


if __name__ == "__main__":
    key = jax.random.PRNGKey(0)
    k_x, k_xs, k_p = jax.random.split(key, 3)

    INPUT_DIM, HIDDEN_DIM, OUTPUT_DIM = 16, 32, 8
    params = init_params(k_p, INPUT_DIM, HIDDEN_DIM, OUTPUT_DIM)
    kparams = prepare_params(params)   # one-time layout prep, out of the hot path

    # Rollout-sized batch -> Pallas kernel path (tile_b=256, 2 grid steps).
    B = 512
    x = jax.random.normal(k_x, (B, INPUT_DIM), jnp.float32)
    policy, value = ppo_forward(x, kparams)
    jax.block_until_ready((policy, value))

    ref_policy, ref_value = reference_forward(x, params)
    assert policy.shape == (B, OUTPUT_DIM) and value.shape == (B, 1)
    assert jnp.allclose(policy, ref_policy, atol=1e-5, rtol=1e-5)
    assert jnp.allclose(value, ref_value, atol=1e-5, rtol=1e-5)
    assert jnp.allclose(jnp.sum(policy, axis=-1), 1.0, atol=1e-5)

    # Tiny actor-step batch -> XLA fallback path (per perf review).
    B_small = 8
    x_small = jax.random.normal(k_xs, (B_small, INPUT_DIM), jnp.float32)
    p_small, v_small = ppo_forward(x_small, kparams)
    jax.block_until_ready((p_small, v_small))
    rp_small, rv_small = reference_forward(x_small, params)
    assert jnp.allclose(p_small, rp_small, atol=1e-5, rtol=1e-5)
    assert jnp.allclose(v_small, rv_small, atol=1e-5, rtol=1e-5)

    print("KERNEL_OK")
</pallas_src>

<mosaic_0001>
module attributes {stable_mosaic.version = 11 : i64} {
  func.func @ppo_kernel(%arg0: i32, %arg1: memref<256x16xf32, #tpu.memory_space<vmem>>, %arg2: memref<16x32xf32, #tpu.memory_space<vmem>>, %arg3: memref<1x32xf32, #tpu.memory_space<vmem>>, %arg4: memref<32x32xf32, #tpu.memory_space<vmem>>, %arg5: memref<1x32xf32, #tpu.memory_space<vmem>>, %arg6: memref<9x32xf32, #tpu.memory_space<vmem>>, %arg7: memref<9x1xf32, #tpu.memory_space<vmem>>, %arg8: memref<9x256xf32, #tpu.memory_space<vmem>>) attributes {dimension_semantics = [#tpu.dimension_semantics<parallel>], iteration_bounds = array<i64: 2>, scalar_prefetch = 0 : i64, scratch_operands = 0 : i64, tpu.core_type = #tpu.core_type<tc>, window_params = [{transform_indices = @transform_0, window_bounds = array<i64: 256, 16>}, {pipeline_mode = #tpu.pipeline_mode<synchronous>, transform_indices = @transform_1, window_bounds = array<i64: 16, 32>}, {pipeline_mode = #tpu.pipeline_mode<synchronous>, transform_indices = @transform_2, window_bounds = array<i64: 1, 32>}, {pipeline_mode = #tpu.pipeline_mode<synchronous>, transform_indices = @transform_3, window_bounds = array<i64: 32, 32>}, {pipeline_mode = #tpu.pipeline_mode<synchronous>, transform_indices = @transform_4, window_bounds = array<i64: 1, 32>}, {pipeline_mode = #tpu.pipeline_mode<synchronous>, transform_indices = @transform_5, window_bounds = array<i64: 9, 32>}, {pipeline_mode = #tpu.pipeline_mode<synchronous>, transform_indices = @transform_6, window_bounds = array<i64: 9, 1>}, {transform_indices = @transform_7, window_bounds = array<i64: 9, 256>}]} {
    %c0 = arith.constant 0 : index
    %c0_0 = arith.constant 0 : index
    %0 = vector.load %arg1[%c0, %c0_0] : memref<256x16xf32, #tpu.memory_space<vmem>>, vector<256x16xf32>
    %c0_1 = arith.constant 0 : index
    %c0_2 = arith.constant 0 : index
    %1 = vector.load %arg2[%c0_1, %c0_2] : memref<16x32xf32, #tpu.memory_space<vmem>>, vector<16x32xf32>
    %cst = arith.constant dense<0.000000e+00> : vector<256x32xf32>
    %2 = tpu.matmul %0, %1, %cst {dimension_numbers = #tpu.dot_dimension_numbers<[1], [0], [0], [1], [0, 0, 1, 1], [], []>} : vector<256x16xf32>, vector<16x32xf32>, vector<256x32xf32> -> vector<256x32xf32>
    %c0_3 = arith.constant 0 : index
    %c0_4 = arith.constant 0 : index
    %3 = vector.load %arg3[%c0_3, %c0_4] : memref<1x32xf32, #tpu.memory_space<vmem>>, vector<1x32xf32>
    %4 = vector.broadcast %3 : vector<1x32xf32> to vector<256x32xf32>
    %5 = arith.addf %2, %4 : vector<256x32xf32>
    %cst_5 = arith.constant 0.000000e+00 : f32
    %6 = vector.broadcast %cst_5 : f32 to vector<256x32xf32>
    %7 = arith.maximumf %5, %6 : vector<256x32xf32>
    %c0_6 = arith.constant 0 : index
    %c0_7 = arith.constant 0 : index
    %8 = vector.load %arg4[%c0_6, %c0_7] : memref<32x32xf32, #tpu.memory_space<vmem>>, vector<32x32xf32>
    %cst_8 = arith.constant dense<0.000000e+00> : vector<256x32xf32>
    %9 = tpu.matmul %7, %8, %cst_8 {dimension_numbers = #tpu.dot_dimension_numbers<[1], [0], [0], [1], [0, 0, 1, 1], [], []>} : vector<256x32xf32>, vector<32x32xf32>, vector<256x32xf32> -> vector<256x32xf32>
    %c0_9 = arith.constant 0 : index
    %c0_10 = arith.constant 0 : index
    %10 = vector.load %arg5[%c0_9, %c0_10] : memref<1x32xf32, #tpu.memory_space<vmem>>, vector<1x32xf32>
    %11 = vector.broadcast %10 : vector<1x32xf32> to vector<256x32xf32>
    %12 = arith.addf %9, %11 : vector<256x32xf32>
    %cst_11 = arith.constant 0.000000e+00 : f32
    %13 = vector.broadcast %cst_11 : f32 to vector<256x32xf32>
    %14 = arith.maximumf %12, %13 : vector<256x32xf32>
    %c0_12 = arith.constant 0 : index
    %c0_13 = arith.constant 0 : index
    %15 = vector.load %arg6[%c0_12, %c0_13] : memref<9x32xf32, #tpu.memory_space<vmem>>, vector<9x32xf32>
    %cst_14 = arith.constant dense<0.000000e+00> : vector<9x256xf32>
    %16 = tpu.matmul %15, %14, %cst_14 {dimension_numbers = #tpu.dot_dimension_numbers<[1], [1], [0], [0], [0, 0, 1, 0], [], []>} : vector<9x32xf32>, vector<256x32xf32>, vector<9x256xf32> -> vector<9x256xf32>
    %c0_15 = arith.constant 0 : index
    %c0_16 = arith.constant 0 : index
    %17 = vector.load %arg7[%c0_15, %c0_16] : memref<9x1xf32, #tpu.memory_space<vmem>>, vector<9x1xf32>
    %18 = vector.broadcast %17 : vector<9x1xf32> to vector<9x256xf32>
    %19 = arith.addf %16, %18 : vector<9x256xf32>
    %20 = tpu.iota {dimensions = array<i32: 0>} : vector<9x256xi32>
    %c8_i32 = arith.constant 8 : i32
    %21 = vector.broadcast %c8_i32 : i32 to vector<9x256xi32>
    %22 = arith.cmpi slt, %20, %21 : vector<9x256xi32>
    %cst_17 = arith.constant 0xFF800000 : f32
    %23 = vector.broadcast %cst_17 : f32 to vector<9x256xf32>
    %24 = arith.select %22, %19, %23 : vector<9x256xi1>, vector<9x256xf32>
    %cst_18 = arith.constant dense<0xFF800000> : vector<256xf32>
    %25 = vector.multi_reduction <maximumf>, %24, %cst_18 [0] : vector<9x256xf32> to vector<256xf32>
    %26 = vector.shape_cast %25 : vector<256xf32> to vector<1x256xf32>
    %27 = vector.broadcast %26 : vector<1x256xf32> to vector<9x256xf32>
    %28 = arith.subf %24, %27 : vector<9x256xf32>
    %29 = math.exp %28 : vector<9x256xf32>
    %cst_19 = arith.constant dense<0.000000e+00> : vector<256xf32>
    %30 = vector.multi_reduction <add>, %29, %cst_19 [0] : vector<9x256xf32> to vector<256xf32>
    %31 = vector.shape_cast %30 : vector<256xf32> to vector<1x256xf32>
    %32 = vector.broadcast %31 : vector<1x256xf32> to vector<9x256xf32>
    %33 = arith.divf %29, %32 : vector<9x256xf32>
    %c8_i32_20 = arith.constant 8 : i32
    %34 = vector.broadcast %c8_i32_20 : i32 to vector<9x256xi32>
    %35 = arith.cmpi eq, %20, %34 : vector<9x256xi32>
    %36 = arith.select %35, %19, %33 : vector<9x256xi1>, vector<9x256xf32>
    %c0_21 = arith.constant 0 : index
    %c0_22 = arith.constant 0 : index
    %37 = vector.load %arg8[%c0_21, %c0_22] : memref<9x256xf32, #tpu.memory_space<vmem>>, vector<9x256xf32>
    tpu.vector_store %arg8[%c0_21, %c0_22], %36 {strides = array<i32>} : memref<9x256xf32, #tpu.memory_space<vmem>>, vector<9x256xf32>,
    return
  }
  func.func @transform_0(%arg0: i32) -> (i32, i32) {
    %c0_i32 = arith.constant 0 : i32
    %c0_i32_0 = arith.constant 0 : i32
    return %arg0, %c0_i32 : i32, i32
  }
  func.func @transform_1(%arg0: i32) -> (i32, i32) {
    %c0_i32 = arith.constant 0 : i32
    %c0_i32_0 = arith.constant 0 : i32
    %c0_i32_1 = arith.constant 0 : i32
    return %c0_i32, %c0_i32_0 : i32, i32
  }
  func.func @transform_2(%arg0: i32) -> (i32, i32) {
    %c0_i32 = arith.constant 0 : i32
    %c0_i32_0 = arith.constant 0 : i32
    %c0_i32_1 = arith.constant 0 : i32
    return %c0_i32, %c0_i32_0 : i32, i32
  }
  func.func @transform_3(%arg0: i32) -> (i32, i32) {
    %c0_i32 = arith.constant 0 : i32
    %c0_i32_0 = arith.constant 0 : i32
    %c0_i32_1 = arith.constant 0 : i32
    return %c0_i32, %c0_i32_0 : i32, i32
  }
  func.func @transform_4(%arg0: i32) -> (i32, i32) {
    %c0_i32 = arith.constant 0 : i32
    %c0_i32_0 = arith.constant 0 : i32
    %c0_i32_1 = arith.constant 0 : i32
    return %c0_i32, %c0_i32_0 : i32, i32
  }
  func.func @transform_5(%arg0: i32) -> (i32, i32) {
    %c0_i32 = arith.constant 0 : i32
    %c0_i32_0 = arith.constant 0 : i32
    %c0_i32_1 = arith.constant 0 : i32
    return %c0_i32, %c0_i32_0 : i32, i32
  }
  func.func @transform_6(%arg0: i32) -> (i32, i32) {
    %c0_i32 = arith.constant 0 : i32
    %c0_i32_0 = arith.constant 0 : i32
    %c0_i32_1 = arith.constant 0 : i32
    return %c0_i32, %c0_i32_0 : i32, i32
  }
  func.func @transform_7(%arg0: i32) -> (i32, i32) {
    %c0_i32 = arith.constant 0 : i32
    %c0_i32_0 = arith.constant 0 : i32
    return %c0_i32, %arg0 : i32, i32
  }
}

</mosaic_0001>

<bundles_post_ra>
// kernel: tpu_custom_call.1
= control target key start
LH: loop header
LB: loop body
LE: loop exit
PB: predicated region body
PF: predicated region fallthrough
CT: control target
= control target key end

     0   :  { %12 = vsyncpa [#allocation3], 0  ;;  %s2259_s0 = inlined_call_operand.vmem [shape: f32[512,16], index: 0, kind: input, shape index: {}]   ;;  %s2260_s1 = inlined_call_operand.vmem [shape: f32[16,32], index: 1, kind: input, shape index: {}]   ;;  %s2261_s2 = inlined_call_operand.vmem [shape: f32[1,32], index: 2, kind: input, shape index: {}]   ;;  %s2262_s3 = inlined_call_operand.vmem [shape: f32[32,32], index: 3, kind: input, shape index: {}]   ;;  %s2263_s4 = inlined_call_operand.vmem [shape: f32[1,32], index: 4, kind: input, shape index: {}]   ;;  %s2264_s5 = inlined_call_operand.vmem [shape: f32[9,32], index: 5, kind: input, shape index: {}]   ;;  %s2265_s6 = inlined_call_operand.vmem [shape: f32[9,1], index: 6, kind: input, shape index: {}]   ;;  %s2266_s7 = inlined_call_operand.hbm [shape: f32[9,512], index: 7, kind: output, shape index: {}]  }
   0x1   :  { %14 = vsyncpa [#allocation3 + $0x1], 0  ;;  %s1869_s24 = smov 0   ;;  %s1871_s25 = smov 0  }
   0x2   :  { %s1873_s26 = smov 0   ;;  %s1875_s27 = smov 0  }
   0x3 LB: > { %s1890_s28 = sadd.s32 4294967295, %s1822_s27   ;;  %s1379_s29 = sadd.s32 4294967294, %s1822_s27   ;;  %s1822_s27 = sphi %s1875_s27, %s2272_s27   ;;  %s1818_s26 = sphi %s1873_s26, %s2271_s26   ;;  %s1814_s25 = sphi %s1871_s25, %s2270_s25   ;;  %s1810_s24 = sphi %s1869_s24, %s2269_s24  }
   0x4   : > { %s1894_s30 = sadd.s32 1, %s1822_s27   ;;  %s179_s8 = sadd.s32 1, %s1818_s26 }
   0x5   : > { %s176_s9 = ssub.s32 %s1822_s27, %s1894_s30  ;;  %p189_p0 = scmp.ne.s32.totalorder %s1818_s26, %s1814_s25 }
   0x6   : > { %p177_p1 = scmp.eq.s32.totalorder %s176_s9, 0  ;;  %p190_p2 = scmp.eq.s32.totalorder %s1890_s28, 1 }
   0x7   : > { %p195_p3 = scmp.ne.s32.totalorder %s1814_s25, %s1810_s24  ;;  %p196_p4 = scmp.eq.s32.totalorder %s1379_s29, 1 }
   0x8   : > { %s1905_s10 = scalar_select %p177_p1, %s1818_s26, %s179_s8  }
   0x9   : > { %p1907_p5 = por %p190_p2, %p189_p0  ;;  %p1911_p6 = por %p196_p4, %p195_p3 }
   0xa   : > { %p1382_p7 = scmp.ge.s32.totalorder %s1822_s27, 1  ;;  %p241_p8 = scmp.lt.s32.totalorder %s1822_s27, 3 }
   0xc   : > { %p242_p9 = pnand %p1382_p7, %p241_p8 }
   0xd   : > { %s1384_s17 = sshll.u32 (!%p242_p9), %s1890_s28, 5  ;;  %s270_s14 = sand.u32 (!%p242_p9), 1, %s1814_s25  }
   0xe   : > { %245 = sbr.rel (%p242_p9) target bundleno = 820 (0x334), region = 48  ;;  %p274_p10 = scmp.lt.s32.totalorder (!%p242_p9), %s1384_s17, 63 }
   0xf   : > { %s1383_s15 = sshll.u32 (!%p242_p9), %s270_s14, 5  ;;  %s1825_s23 = smov (!%p242_p9), [#allocation2]  }
  0x10   : > { %s272_s16 = scalar_lea.vmem (!%p242_p9), [#allocation2], %s1383_s15  ;;  %s1766_s29 = sshll.u32 (!%p242_p9), %s1825_s23, 4  ;;  %s1767_s29 = int_to_ptr.vmem [resolvable:$false] %s1766_s29 }
  0x11   : > { %s1768_s8 = scalar_lea.vmem (!%p242_p9), %s1767_s29, 1024 }
  0x13   : > { %v313_v0 = vld [vmem:[%s2260_s1 + $0x8] sm:$0xff]  ;;  %v312_v1 = vld [vmem:[%s2260_s1] sm:$0xff]  ;;  %s2274_s17 = smov (!%p274_p10, %s1384_s17), 63  ;;  %vm321_vm0 = vcmask 130048   ;;  %v678_v34 = vld [vmem:[%s2262_s3 + $0x18] sm:$0xff]  ;;  %vm686_vm1 = vcmask 261120  }
  0x14   : > { %1598 = vmatprep.subr.mxu0 %v313_v0  ;;  %s1385_s18 = sshll.u32 %s2274_s17, 3  ;;  %1650 = vmatprep.subr.mxu1 %v678_v34  ;;  %v677_v35 = vld [vmem:[%s2262_s3 + $0x10] sm:$0xff]  ;;  %v676_v36 = vld [vmem:[%s2262_s3 + $0x8] sm:$0xff]  ;;  %v675_v37 = vld [vmem:[%s2262_s3] sm:$0xff]  ;;  %vm1242_vm2 = vcmask 1040384   ;;  %s1317_s17 = sshll.u32 %s272_s16, 4  ;;  %s2210_s17 = int_to_ptr.vmem [resolvable:$true] %s1317_s17 }
  0x15   : > { %1599 = vmatpush3.msra.mxu0 %v313_v0  ;;  %s1927_s21 = scalar_lea.vmem %s2259_s0, %s1385_s18  ;;  %1651 = vmatpush3.msra.mxu1 %v678_v34  ;;  %v2008_v38 = vld [vmem:[%s2261_s2] ss:$0 sm:$0xff]  ;;  %s1491_s18 = sshll.u32 %s1890_s28, 8 }
  0x16   : > { %1600 = vmatprep.subr.mxu0 %v312_v1  ;;  %v280_v2 = vld [vmem:[%s1927_s21] sm:$0xff]  ;;  %v281_v3 = vld [vmem:[%s1927_s21 + $0x8] sm:$0xff]  ;;  %v282_v4 = vld [vmem:[%s1927_s21 + $0x10] sm:$0xff]  ;;  %1652 = vmatprep.subr.mxu1 %v677_v35  ;;  %s2216_s28 = scalar_lea.hbm %s2266_s7, %s1491_s18  ;;  %s1762_s22 = scalar_lea.vmem %s2210_s17, 512 }
  0x17   : > { %1601 = vmatpush3.msra.mxu0 %v312_v1  ;;  %1602 = vmatprep.mubr.msk.f32.mxu0 %vm321_vm0, %v280_v2  ;;  %v283_v5 = vld [vmem:[%s1927_s21 + $0x18] sm:$0xff]  ;;  %v284_v6 = vld [vmem:[%s1927_s21 + $0x20] sm:$0xff]  ;;  %v285_v7 = vld [vmem:[%s1927_s21 + $0x28] sm:$0xff]  ;;  %p1763_p11 = scmp.ne.s32.totalorder %s2210_s17, %s1762_s22  ;;  %p1769_p0 = scmp.lt.s32.totalorder %s2210_s17, %s1767_s29 }
  0x18   : > { %1603 = vmatmul.mubr.msk.f32.vlgmr.msra.gmra.mxu0 %vm321_vm0, %v281_v3  ;;  %v286_v8 = vld [vmem:[%s1927_s21 + $0x30] sm:$0xff]  ;;  %v287_v9 = vld [vmem:[%s1927_s21 + $0x38] sm:$0xff]  ;;  %v288_v10 = vld [vmem:[%s1927_s21 + $0x40] sm:$0xff]  ;;  %1653 = vmatpush3.msra.mxu1 %v677_v35  ;;  %p1770_p1 = scmp.lt.s32.totalorder %s1768_s8, %s1762_s22 }
  0x19   : > { %1605 = vmatprep.mubr.msk.f32.mxu0 %vm321_vm0, %v282_v4  ;;  %v289_v11 = vld [vmem:[%s1927_s21 + $0x48] sm:$0xff]  ;;  %v290_v12 = vld [vmem:[%s1927_s21 + $0x50] sm:$0xff]  ;;  %v291_v13 = vld [vmem:[%s1927_s21 + $0x58] sm:$0xff]  ;;  %1654 = vmatprep.subr.mxu1 %v676_v36  ;;  %p1764_p12 = pnand %p1763_p11, %p1907_p5 }
  0x1a   : > { %v292_v14 = vld [vmem:[%s1927_s21 + $0x60] sm:$0xff]  ;;  %v293_v15 = vld [vmem:[%s1927_s21 + $0x68] sm:$0xff]  ;;  %v294_v16 = vld [vmem:[%s1927_s21 + $0x70] sm:$0xff]  ;;  %1655 = vmatpush3.msra.mxu1 %v676_v36  ;;  %p1771_p2 = por %p1770_p1, %p1769_p0 }
  0x1b   : > { %v295_v17 = vld [vmem:[%s1927_s21 + $0x78] sm:$0xff]  ;;  %v296_v18 = vld [vmem:[%s1927_s21 + $0x80] sm:$0xff]  ;;  %v297_v19 = vld [vmem:[%s1927_s21 + $0x88] sm:$0xff]  ;;  %1656 = vmatprep.subr.mxu1 %v675_v37  ;;  %p1765_p13 = pneg %p1764_p12 }
  0x1c   : > { %1606 = vmatmul.mubr.msk.f32.gmra.mxu0 %vm321_vm0, %v283_v5  ;;  %v298_v20 = vld [vmem:[%s1927_s21 + $0x90] sm:$0xff]  ;;  %v299_v21 = vld [vmem:[%s1927_s21 + $0x98] sm:$0xff]  ;;  %v300_v22 = vld [vmem:[%s1927_s21 + $0xa0] sm:$0xff]  ;;  %1657 = vmatpush3.msra.mxu1 %v675_v37 }
  0x1d   : > { %1608 = vmatprep.mubr.msk.f32.mxu0 %vm321_vm0, %v284_v6  ;;  %v301_v23 = vld [vmem:[%s1927_s21 + $0xa8] sm:$0xff]  ;;  %v302_v24 = vld [vmem:[%s1927_s21 + $0xb0] sm:$0xff]  ;;  %v303_v25 = vld [vmem:[%s1927_s21 + $0xb8] sm:$0xff]  ;;  %p1772_p3 = pnand %p1771_p2, %p1765_p13 }
  0x1e   : > { %v304_v26 = vld [vmem:[%s1927_s21 + $0xc0] sm:$0xff]  ;;  %v305_v27 = vld [vmem:[%s1927_s21 + $0xc8] sm:$0xff]  ;;  %v306_v28 = vld [vmem:[%s1927_s21 + $0xd0] sm:$0xff] }
  0x1f   : > { %v307_v29 = vld [vmem:[%s1927_s21 + $0xd8] sm:$0xff]  ;;  %v308_v30 = vld [vmem:[%s1927_s21 + $0xe0] sm:$0xff]  ;;  %v309_v31 = vld [vmem:[%s1927_s21 + $0xe8] sm:$0xff] }
  0x20   : > { %1609 = vmatmul.mubr.msk.f32.gmra.mxu0 %vm321_vm0, %v285_v7  ;;  %v310_v32 = vld [vmem:[%s1927_s21 + $0xf0] sm:$0xff]  ;;  %v311_v33 = vld [vmem:[%s1927_s21 + $0xf8] sm:$0xff]  ;;  %s2219_s21 = scalar_lea.sflag [#allocation3], %s270_s14 }
  0x21   : > { %1611 = vmatprep.mubr.msk.f32.mxu0 %vm321_vm0, %v286_v8 }
  0x24   : > { %1612 = vmatmul.mubr.msk.f32.gmra.mxu0 %vm321_vm0, %v287_v9 }
  0x25   : > { %1614 = vmatprep.mubr.msk.f32.mxu0 %vm321_vm0, %v288_v10 }
  0x28   : > { %1615 = vmatmul.mubr.msk.f32.gmra.mxu0 %vm321_vm0, %v289_v11 }
  0x29   : > { %1617 = vmatprep.mubr.msk.f32.mxu0 %vm321_vm0, %v290_v12 }
  0x2c   : > { %1618 = vmatmul.mubr.msk.f32.gmra.mxu0 %vm321_vm0, %v291_v13 }
  0x2d   : > { %1620 = vmatprep.mubr.msk.f32.mxu0 %vm321_vm0, %v292_v14 }
  0x30   : > { %1621 = vmatmul.mubr.msk.f32.gmra.mxu0 %vm321_vm0, %v293_v15 }
  0x31   : > { %1623 = vmatprep.mubr.msk.f32.mxu0 %vm321_vm0, %v294_v16 }
  0x34   : > { %1624 = vmatmul.mubr.msk.f32.gmra.mxu0 %vm321_vm0, %v295_v17 }
  0x35   : > { %1626 = vmatprep.mubr.msk.f32.mxu0 %vm321_vm0, %v296_v18 }
  0x38   : > { %1627 = vmatmul.mubr.msk.f32.gmra.mxu0 %vm321_vm0, %v297_v19 }
  0x39   : > { %1629 = vmatprep.mubr.msk.f32.mxu0 %vm321_vm0, %v298_v20 }
  0x3c   : > { %1630 = vmatmul.mubr.msk.f32.gmra.mxu0 %vm321_vm0, %v299_v21 }
  0x3d   : > { %1632 = vmatprep.mubr.msk.f32.mxu0 %vm321_vm0, %v300_v22 }
  0x40   : > { %1633 = vmatmul.mubr.msk.f32.gmra.mxu0 %vm321_vm0, %v301_v23 }
  0x41   : > { %1635 = vmatprep.mubr.msk.f32.mxu0 %vm321_vm0, %v302_v24 }
  0x44   : > { %1636 = vmatmul.mubr.msk.f32.gmra.mxu0 %vm321_vm0, %v303_v25 }
  0x45   : > { %1638 = vmatprep.mubr.msk.f32.mxu0 %vm321_vm0, %v304_v26 }
  0x48   : > { %1639 = vmatmul.mubr.msk.f32.gmra.mxu0 %vm321_vm0, %v305_v27 }
  0x49   : > { %1641 = vmatprep.mubr.msk.f32.mxu0 %vm321_vm0, %v306_v28 }
  0x4c   : > { %1642 = vmatmul.mubr.msk.f32.gmra.mxu0 %vm321_vm0, %v307_v29 }
  0x4d   : > { %1644 = vmatprep.mubr.msk.f32.mxu0 %vm321_vm0, %v308_v30 }
  0x50   : > { %1645 = vmatmul.mubr.msk.f32.gmra.mxu0 %vm321_vm0, %v309_v31 }
  0x51   : > { %1647 = vmatprep.mubr.msk.f32.mxu0 %vm321_vm0, %v310_v32 }
  0x54   : > { %1648 = vmatmul.mubr.msk.f32.gmra.mxu0 %vm321_vm0, %v311_v33 }
  0xd8   : > { %v1604_v39 = vpop.f32.mrf.mxu0 }
  0xd9   : > { %v490_v40 = vadd.f32 %v1604_v39, %v2008_v38 }
  0xda   : > { %v484_v41 = vpop.f32.mrf.mxu0 }
  0xdb   : > { %v485_v42 = vadd.f32 %v2008_v38, %v484_v41  ;;  %v644_v45 = vmax.f32 %v490_v40, 0.0 }
  0xdc   : > { %v1607_v43 = vpop.f32.mrf.mxu0 }
  0xdd   : > { %v643_v44 = vmax.f32 %v485_v42, 0.0  ;;  %v500_v46 = vadd.f32 %v1607_v43, %v2008_v38 }
  0xde   : > { %v494_v47 = vpop.f32.mrf.mxu0 }
  0xdf   : > { %v495_v48 = vadd.f32 %v2008_v38, %v494_v47  ;;  %1658 = vmatprep.mubr.msk.f32.mxu1 %vm686_vm1, %v643_v44  ;;  %v646_v51 = vmax.f32 %v500_v46, 0.0 }
  0xe0   : > { %v1610_v49 = vpop.f32.mrf.mxu0  ;;  %1659 = vmatmul.mubr.msk.f32.vlgmr.msra.gmra.mxu1 %vm686_vm1, %v644_v45 }
  0xe1   : > { %v645_v50 = vmax.f32 %v495_v48, 0.0  ;;  %v510_v52 = vadd.f32 %v1610_v49, %v2008_v38 }
  0xe2   : > { %v504_v53 = vpop.f32.mrf.mxu0 }
  0xe3   : > { %v505_v54 = vadd.f32 %v2008_v38, %v504_v53  ;;  %1661 = vmatprep.mubr.msk.f32.mxu1 %vm686_vm1, %v645_v50  ;;  %v648_v57 = vmax.f32 %v510_v52, 0.0 }
  0xe4   : > { %v1613_v55 = vpop.f32.mrf.mxu0  ;;  %1662 = vmatmul.mubr.msk.f32.gmra.mxu1 %vm686_vm1, %v646_v51 }
  0xe5   : > { %v647_v56 = vmax.f32 %v505_v54, 0.0  ;;  %v520_v58 = vadd.f32 %v1613_v55, %v2008_v38 }
  0xe6   : > { %v514_v59 = vpop.f32.mrf.mxu0 }
  0xe7   : > { %v515_v60 = vadd.f32 %v2008_v38, %v514_v59  ;;  %1664 = vmatprep.mubr.msk.f32.mxu1 %vm686_vm1, %v647_v56  ;;  %v650_v63 = vmax.f32 %v520_v58, 0.0 }
  0xe8   : > { %v1616_v61 = vpop.f32.mrf.mxu0  ;;  %1665 = vmatmul.mubr.msk.f32.gmra.mxu1 %vm686_vm1, %v648_v57 }
  0xe9   : > { %v649_v62 = vmax.f32 %v515_v60, 0.0  ;;  %v530_v0 = vadd.f32 %v1616_v61, %v2008_v38 }
  0xea   : > { %v524_v1 = vpop.f32.mrf.mxu0 }
  0xeb   : > { %v525_v2 = vadd.f32 %v2008_v38, %v524_v1  ;;  %1667 = vmatprep.mubr.msk.f32.mxu1 %vm686_vm1, %v649_v62  ;;  %v652_v5 = vmax.f32 %v530_v0, 0.0 }
  0xec   : > { %v1619_v3 = vpop.f32.mrf.mxu0  ;;  %1668 = vmatmul.mubr.msk.f32.gmra.mxu1 %vm686_vm1, %v650_v63 }
  0xed   : > { %v651_v4 = vmax.f32 %v525_v2, 0.0  ;;  %v540_v6 = vadd.f32 %v1619_v3, %v2008_v38 }
  0xee   : > { %v534_v7 = vpop.f32.mrf.mxu0 }
  0xef   : > { %v535_v8 = vadd.f32 %v2008_v38, %v534_v7  ;;  %1670 = vmatprep.mubr.msk.f32.mxu1 %vm686_vm1, %v651_v4  ;;  %v654_v11 = vmax.f32 %v540_v6, 0.0 }
  0xf0   : > { %v1622_v9 = vpop.f32.mrf.mxu0  ;;  %1671 = vmatmul.mubr.msk.f32.gmra.mxu1 %vm686_vm1, %v652_v5 }
  0xf1   : > { %v653_v10 = vmax.f32 %v535_v8, 0.0  ;;  %v550_v12 = vadd.f32 %v1622_v9, %v2008_v38  ;;  %v2077_v8 = vld [vmem:[%s2264_s5] sm:$0xff] }
  0xf2   : > { %v544_v13 = vpop.f32.mrf.mxu0  ;;  %1594 = vmatprep.mubr.msk.f32.mxu0 %vm686_vm1, %v2077_v8 }
  0xf3   : > { %v545_v14 = vadd.f32 %v2008_v38, %v544_v13  ;;  %1673 = vmatprep.mubr.msk.f32.mxu1 %vm686_vm1, %v653_v10  ;;  %v656_v17 = vmax.f32 %v550_v12, 0.0  ;;  %v1824_v13 = vmov 0  }
  0xf4   : > { %v1625_v15 = vpop.f32.mrf.mxu0  ;;  %1674 = vmatmul.mubr.msk.f32.gmra.mxu1 %vm686_vm1, %v654_v11  ;;  %v1042_v11 = vld [vmem:[%s2265_s6] sm:$0xff]  ;;  %1749 = vset.pattern.permute.xlu0 %v1824_v13 }
  0xf5   : > { %v655_v16 = vmax.f32 %v545_v14, 0.0  ;;  %v560_v18 = vadd.f32 %v1625_v15, %v2008_v38  ;;  %1046 = vperm.xlu0 %1749, %v1042_v11   ;;  %v1043_v15 = vld [vmem:[%s2265_s6 + $0x8] sm:$0x1] }
  0xf6   : > { %v554_v19 = vpop.f32.mrf.mxu0 }
  0xf7   : > { %v555_v20 = vadd.f32 %v2008_v38, %v554_v19  ;;  %1676 = vmatprep.mubr.msk.f32.mxu1 %vm686_vm1, %v655_v16  ;;  %v658_v23 = vmax.f32 %v560_v18, 0.0 }
  0xf8   : > { %v1628_v21 = vpop.f32.mrf.mxu0  ;;  %1677 = vmatmul.mubr.msk.f32.gmra.mxu1 %vm686_vm1, %v656_v17 }
  0xf9   : > { %v657_v22 = vmax.f32 %v555_v20, 0.0  ;;  %v570_v24 = vadd.f32 %v1628_v21, %v2008_v38  ;;  %1051 = vperm.xlu0 %1749, %v1043_v15  }
  0xfa   : > { %v564_v25 = vpop.f32.mrf.mxu0 }
  0xfb   : > { %v565_v26 = vadd.f32 %v2008_v38, %v564_v25  ;;  %1679 = vmatprep.mubr.msk.f32.mxu1 %vm686_vm1, %v657_v22  ;;  %v660_v29 = vmax.f32 %v570_v24, 0.0 }
  0xfc   : > { %v1631_v27 = vpop.f32.mrf.mxu0  ;;  %1680 = vmatmul.mubr.msk.f32.gmra.mxu1 %vm686_vm1, %v658_v23 }
  0xfd   : > { %v659_v28 = vmax.f32 %v565_v26, 0.0  ;;  %v580_v30 = vadd.f32 %v1631_v27, %v2008_v38 }
  0xfe   : > { %v574_v31 = vpop.f32.mrf.mxu0 }
  0xff   : > { %v575_v32 = vadd.f32 %v2008_v38, %v574_v31  ;;  %1682 = vmatprep.mubr.msk.f32.mxu1 %vm686_vm1, %v659_v28  ;;  %v662_v35 = vmax.f32 %v580_v30, 0.0 }
 0x100   : > { %v1634_v33 = vpop.f32.mrf.mxu0  ;;  %1683 = vmatmul.mubr.msk.f32.gmra.mxu1 %vm686_vm1, %v660_v29 }
 0x101   : > { %v661_v34 = vmax.f32 %v575_v32, 0.0  ;;  %v590_v36 = vadd.f32 %v1634_v33, %v2008_v38 }
 0x102   : > { %v584_v37 = vpop.f32.mrf.mxu0 }
 0x103   : > { %v585_v39 = vadd.f32 %v2008_v38, %v584_v37  ;;  %1685 = vmatprep.mubr.msk.f32.mxu1 %vm686_vm1, %v661_v34  ;;  %v664_v42 = vmax.f32 %v590_v36, 0.0 }
 0x104   : > { %v1637_v40 = vpop.f32.mrf.mxu0  ;;  %1686 = vmatmul.mubr.msk.f32.gmra.mxu1 %vm686_vm1, %v662_v35 }
 0x105   : > { %v663_v41 = vmax.f32 %v585_v39, 0.0  ;;  %v600_v43 = vadd.f32 %v1637_v40, %v2008_v38 }
 0x106   : > { %v594_v44 = vpop.f32.mrf.mxu0 }
 0x107   : > { %v595_v45 = vadd.f32 %v2008_v38, %v594_v44  ;;  %1688 = vmatprep.mubr.msk.f32.mxu1 %vm686_vm1, %v663_v41  ;;  %v666_v48 = vmax.f32 %v600_v43, 0.0 }
 0x108   : > { %v1640_v46 = vpop.f32.mrf.mxu0  ;;  %1689 = vmatmul.mubr.msk.f32.gmra.mxu1 %vm686_vm1, %v664_v42  ;;  %v2120_v42 = vld [vmem:[%s2263_s4] ss:$0 sm:$0xff] }
 0x109   : > { %v665_v47 = vmax.f32 %v595_v45, 0.0  ;;  %v610_v49 = vadd.f32 %v1640_v46, %v2008_v38 }
 0x10a   : > { %v604_v50 = vpop.f32.mrf.mxu0 }
 0x10b   : > { %v605_v51 = vadd.f32 %v2008_v38, %v604_v50  ;;  %1691 = vmatprep.mubr.msk.f32.mxu1 %vm686_vm1, %v665_v47  ;;  %v668_v54 = vmax.f32 %v610_v49, 0.0 }
 0x10c   : > { %v1643_v52 = vpop.f32.mrf.mxu0  ;;  %1692 = vmatmul.mubr.msk.f32.gmra.mxu1 %vm686_vm1, %v666_v48 }
 0x10d   : > { %v667_v53 = vmax.f32 %v605_v51, 0.0  ;;  %v620_v55 = vadd.f32 %v1643_v52, %v2008_v38 }
 0x10e   : > { %v614_v56 = vpop.f32.mrf.mxu0 }
 0x10f   : > { %v615_v57 = vadd.f32 %v2008_v38, %v614_v56  ;;  %1694 = vmatprep.mubr.msk.f32.mxu1 %vm686_vm1, %v667_v53  ;;  %v670_v60 = vmax.f32 %v620_v55, 0.0 }
 0x110   : > { %v1646_v58 = vpop.f32.mrf.mxu0  ;;  %1695 = vmatmul.mubr.msk.f32.gmra.mxu1 %vm686_vm1, %v668_v54 }
 0x111   : > { %v669_v59 = vmax.f32 %v615_v57, 0.0  ;;  %v630_v61 = vadd.f32 %v1646_v58, %v2008_v38 }
 0x112   : > { %v624_v62 = vpop.f32.mrf.mxu0 }
 0x113   : > { %v625_v63 = vadd.f32 %v2008_v38, %v624_v62  ;;  %1697 = vmatprep.mubr.msk.f32.mxu1 %vm686_vm1, %v669_v59  ;;  %v672_v2 = vmax.f32 %v630_v61, 0.0 }
 0x114   : > { %v1649_v0 = vpop.f32.mrf.mxu0  ;;  %1698 = vmatmul.mubr.msk.f32.gmra.mxu1 %vm686_vm1, %v670_v60 }
 0x115   : > { %v671_v1 = vmax.f32 %v625_v63, 0.0  ;;  %v640_v3 = vadd.f32 %v1649_v0, %v2008_v38 }
 0x116   : > { %v634_v4 = vpop.f32.mrf.mxu0 }
 0x117   : > { %v635_v5 = vadd.f32 %v2008_v38, %v634_v4  ;;  %1700 = vmatprep.mubr.msk.f32.mxu1 %vm686_vm1, %v671_v1  ;;  %v674_v7 = vmax.f32 %v640_v3, 0.0 }
 0x118   : > { %1701 = vmatmul.mubr.msk.f32.gmra.mxu1 %vm686_vm1, %v672_v2 }
 0x119   : > { %v673_v6 = vmax.f32 %v635_v5, 0.0 }
 0x11b   : > { %1703 = vmatprep.mubr.msk.f32.mxu1 %vm686_vm1, %v673_v6 }
 0x11c   : > { %1704 = vmatmul.mubr.msk.f32.gmra.mxu1 %vm686_vm1, %v674_v7 }
 0x1a0   : > { %v2081_v9 = vpop.f32.mrf.mxu1 }
 0x1a2   : > { %v2083_v38 = vpop.f32.mrf.mxu1 }
 0x1a4   : > { %v2085_v10 = vpop.f32.mrf.mxu1 }
 0x1a6   : > { %v2090_v12 = vpop.f32.mrf.mxu1 }
 0x1a8   : > { %v2092_v14 = vpop.f32.mrf.mxu1 }
 0x1aa   : > { %v2097_v16 = vpop.f32.mrf.mxu1 }
 0x1ac   : > { %v2099_v17 = vpop.f32.mrf.mxu1 }
 0x1ae   : > { %v2101_v18 = vpop.f32.mrf.mxu1 }
 0x1b0   : > { %v1672_v19 = vpop.f32.mrf.mxu1 }
 0x1b1   : > { %v895_v5 = vadd.f32 %v1672_v19, %v2120_v42  ;;  %v885_v19 = vadd.f32 %v2099_v17, %v2120_v42  ;;  %v875_v17 = vadd.f32 %v2092_v14, %v2120_v42  ;;  %v865_v14 = vadd.f32 %v2085_v10, %v2120_v42 }
 0x1b2   : > { %v2103_v20 = vpop.f32.mrf.mxu1  ;;  %v855_v10 = vadd.f32 %v2081_v9, %v2120_v42  ;;  %v1041_v9 = vld [vmem:[%s2264_s5 + $0x8] sm:$0x1] }
 0x1b3   : > { %v1017_v13 = vmax.f32 %v895_v5, 0.0  ;;  %v890_v15 = vadd.f32 %v2120_v42, %v2103_v20  ;;  %v880_v20 = vadd.f32 %v2120_v42, %v2101_v18  ;;  %v1013_v18 = vmax.f32 %v875_v17, 0.0 }
 0x1b4   : > { %v1675_v21 = vpop.f32.mrf.mxu1 }
 0x1b5   : > { %v905_v61 = vadd.f32 %v1675_v21, %v2120_v42 }
 0x1b6   : > { %v899_v22 = vpop.f32.mrf.mxu1 }
 0x1b7   : > { %v1019_v1 = vmax.f32 %v905_v61, 0.0  ;;  %v900_v2 = vadd.f32 %v2120_v42, %v899_v22 }
 0x1b8   : > { %v1678_v23 = vpop.f32.mrf.mxu1 }
 0x1b9   : > { %v915_v53 = vadd.f32 %v1678_v23, %v2120_v42  ;;  %v1018_v6 = vmax.f32 %v900_v2, 0.0  ;;  %v1016_v23 = vmax.f32 %v890_v15, 0.0 }
 0x1ba   : > { %v909_v24 = vpop.f32.mrf.mxu1 }
 0x1bb   : > { %v1021_v57 = vmax.f32 %v915_v53, 0.0  ;;  %v910_v58 = vadd.f32 %v2120_v42, %v909_v24 }
 0x1bc   : > { %v1681_v25 = vpop.f32.mrf.mxu1 }
 0x1bd   : > { %v925_v43 = vadd.f32 %v1681_v25, %v2120_v42  ;;  %v1020_v62 = vmax.f32 %v910_v58, 0.0 }
 0x1be   : > { %v919_v26 = vpop.f32.mrf.mxu1 }
 0x1bf   : > { %v1023_v49 = vmax.f32 %v925_v43, 0.0  ;;  %v920_v50 = vadd.f32 %v2120_v42, %v919_v26  ;;  %v1015_v26 = vmax.f32 %v885_v19, 0.0 }
 0x1c0   : > { %v2105_v27 = vpop.f32.mrf.mxu1 }
 0x1c1   : > { %v1022_v54 = vmax.f32 %v920_v50, 0.0 }
 0x1c2   : > { %v2107_v28 = vpop.f32.mrf.mxu1 }
 0x1c4   : > { %v2109_v29 = vpop.f32.mrf.mxu1 }
 0x1c6   : > { %v2111_v30 = vpop.f32.mrf.mxu1 }
 0x1c7   : > { %v940_v43 = vadd.f32 %v2120_v42, %v2111_v30 }
 0x1c8   : > { %v2113_v31 = vpop.f32.mrf.mxu1 }
 0x1ca   : > { %v2115_v32 = vpop.f32.mrf.mxu1 }
 0x1cc   : > { %v1693_v33 = vpop.f32.mrf.mxu1 }
 0x1cd   : > { %v965_v21 = vadd.f32 %v1693_v33, %v2120_v42  ;;  %v955_v33 = vadd.f32 %v2113_v31, %v2120_v42  ;;  %v870_v31 = vadd.f32 %v2120_v42, %v2097_v16  ;;  %v1011_v16 = vmax.f32 %v865_v14, 0.0 }
 0x1ce   : > { %v959_v34 = vpop.f32.mrf.mxu1 }
 0x1cf   : > { %v1031_v24 = vmax.f32 %v965_v21, 0.0  ;;  %v960_v25 = vadd.f32 %v2120_v42, %v959_v34  ;;  %v1014_v34 = vmax.f32 %v880_v20, 0.0 }
 0x1d0   : > { %v1696_v35 = vpop.f32.mrf.mxu1 }
 0x1d1   : > { %v975_v3 = vadd.f32 %v1696_v35, %v2120_v42  ;;  %v1030_v35 = vmax.f32 %v960_v25, 0.0 }
 0x1d2   : > { %v969_v36 = vpop.f32.mrf.mxu1 }
 0x1d3   : > { %v1033_v7 = vmax.f32 %v975_v3, 0.0  ;;  %v970_v11 = vadd.f32 %v2120_v42, %v969_v36  ;;  %v1029_v36 = vmax.f32 %v955_v33, 0.0 }
 0x1d4   : > { %v1699_v37 = vpop.f32.mrf.mxu1 }
 0x1d5   : > { %v985_v59 = vadd.f32 %v1699_v37, %v2120_v42  ;;  %v1032_v22 = vmax.f32 %v970_v11, 0.0  ;;  %v950_v37 = vadd.f32 %v2120_v42, %v2115_v32  ;;  %v1012_v32 = vmax.f32 %v870_v31, 0.0 }
 0x1d6   : > { %v979_v39 = vpop.f32.mrf.mxu1 }
 0x1d7   : > { %v1035_v63 = vmax.f32 %v985_v59, 0.0  ;;  %v980_v0 = vadd.f32 %v2120_v42, %v979_v39  ;;  %v945_v39 = vadd.f32 %v2109_v29, %v2120_v42  ;;  %v860_v29 = vadd.f32 %v2120_v42, %v2090_v12 }
 0x1d8   : > { %v1702_v40 = vpop.f32.mrf.mxu1  ;;  %v1009_v12 = vmax.f32 %v855_v10, 0.0 }
 0x1d9   : > { %v995_v51 = vadd.f32 %v1702_v40, %v2120_v42  ;;  %v1034_v4 = vmax.f32 %v980_v0, 0.0  ;;  %v1028_v40 = vmax.f32 %v950_v37, 0.0  ;;  %v1010_v30 = vmax.f32 %v860_v29, 0.0 }
 0x1da   : > { %v989_v41 = vpop.f32.mrf.mxu1 }
 0x1db   : > { %v1037_v55 = vmax.f32 %v995_v51, 0.0  ;;  %v990_v56 = vadd.f32 %v2120_v42, %v989_v41  ;;  %v1027_v41 = vmax.f32 %v945_v39, 0.0  ;;  %v1233_v39 = vlaneseq }
 0x1dc   : > { %v1705_v44 = vpop.f32.mrf.mxu1 }
 0x1dd   : > { %v1005_v45 = vadd.f32 %v1705_v44, %v2120_v42  ;;  %v1036_v60 = vmax.f32 %v990_v56, 0.0  ;;  %v935_v44 = vadd.f32 %v2105_v27, %v2120_v42  ;;  %v850_v27 = vadd.f32 %v2120_v42, %v2083_v38  ;;  %v1047_v38 = vpop.permute.xlu0 %1046 }
 0x1de   : > { %v999_v46 = vpop.f32.mrf.mxu1 }
 0x1df   : > { %v1039_v47 = vmax.f32 %v1005_v45, 0.0  ;;  %v1000_v48 = vadd.f32 %v2120_v42, %v999_v46  ;;  %v1026_v45 = vmax.f32 %v940_v43, 0.0  ;;  %v1025_v46 = vmax.f32 %v935_v44, 0.0 }
 0x1e1   : > { %v1038_v52 = vmax.f32 %v1000_v48, 0.0  ;;  %1562 = vmatprep.subr.msk.mxu0 %vm686_vm1, %v1039_v47  ;;  %v930_v47 = vadd.f32 %v2120_v42, %v2107_v28  ;;  %v1052_v43 = vpop.permute.xlu0 %1051 }
 0x1e2   : > { %1563 = vmatpush3.xpose.msk.msra.mxu0 %vm686_vm1, %v1023_v49  ;;  %v1008_v49 = vmax.f32 %v850_v27, 0.0 }
 0x1e3   : > { %1564 = vmatprep.subr.msk.mxu0 %vm686_vm1, %v1038_v52  ;;  %v1024_v48 = vmax.f32 %v930_v47, 0.0 }
 0x1e6   : > { %1565 = vmatpush3.xpose.msk.msra.mxu0 %vm686_vm1, %v1022_v54 }
 0x1e7   : > { %1566 = vmatprep.subr.msk.mxu0 %vm686_vm1, %v1037_v55 }
 0x1ea   : > { %1567 = vmatpush3.xpose.msk.msra.mxu0 %vm686_vm1, %v1021_v57 }
 0x1eb   : > { %1568 = vmatprep.subr.msk.mxu0 %vm686_vm1, %v1036_v60 }
 0x1ee   : > { %1569 = vmatpush3.xpose.msk.msra.mxu0 %vm686_vm1, %v1020_v62 }
 0x1ef   : > { %1570 = vmatprep.subr.msk.mxu0 %vm686_vm1, %v1035_v63 }
 0x1f2   : > { %1571 = vmatpush3.xpose.msk.msra.mxu0 %vm686_vm1, %v1019_v1 }
 0x1f3   : > { %1572 = vmatprep.subr.msk.mxu0 %vm686_vm1, %v1034_v4 }
 0x1f6   : > { %1573 = vmatpush3.xpose.msk.msra.mxu0 %vm686_vm1, %v1018_v6 }
 0x1f7   : > { %1574 = vmatprep.subr.msk.mxu0 %vm686_vm1, %v1033_v7 }
 0x1fa   : > { %1575 = vmatpush3.xpose.msk.msra.mxu0 %vm686_vm1, %v1017_v13 }
 0x1fb   : > { %1576 = vmatprep.subr.msk.mxu0 %vm686_vm1, %v1032_v22 }
 0x1fe   : > { %1577 = vmatpush3.xpose.msk.msra.mxu0 %vm686_vm1, %v1016_v23 }
 0x1ff   : > { %1578 = vmatprep.subr.msk.mxu0 %vm686_vm1, %v1031_v24 }
 0x202   : > { %1579 = vmatpush3.xpose.msk.msra.mxu0 %vm686_vm1, %v1015_v26 }
 0x203   : > { %1580 = vmatprep.subr.msk.mxu0 %vm686_vm1, %v1030_v35 }
 0x206   : > { %1581 = vmatpush3.xpose.msk.msra.mxu0 %vm686_vm1, %v1014_v34 }
 0x207   : > { %1582 = vmatprep.subr.msk.mxu0 %vm686_vm1, %v1029_v36 }
 0x20a   : > { %1583 = vmatpush3.xpose.msk.msra.mxu0 %vm686_vm1, %v1013_v18 }
 0x20b   : > { %1584 = vmatprep.subr.msk.mxu0 %vm686_vm1, %v1028_v40  ;;  %v1234_v40 = vshrl.u32 %v1233_v39, 7 }
 0x20e   : > { %1585 = vmatpush3.xpose.msk.msra.mxu0 %vm686_vm1, %v1012_v32  ;;  %v1235_v32 = vadd.s32 8, %v1234_v40 }
 0x20f   : > { %1586 = vmatprep.subr.msk.mxu0 %vm686_vm1, %v1027_v41 }
 0x210   : > { %vm1294_vm3 = vcmp.eq.s32.totalorder %v1235_v32, 8 }
 0x212   : > { %1587 = vmatpush3.xpose.msk.msra.mxu0 %vm686_vm1, %v1011_v16 }
 0x213   : > { %1588 = vmatprep.subr.msk.mxu0 %vm686_vm1, %v1026_v45 }
 0x216   : > { %1589 = vmatpush3.xpose.msk.msra.mxu0 %vm686_vm1, %v1010_v30 }
 0x217   : > { %1590 = vmatprep.subr.msk.mxu0 %vm686_vm1, %v1025_v46 }
 0x21a   : > { %1591 = vmatpush3.xpose.msk.msra.mxu0 %vm686_vm1, %v1009_v12 }
 0x21b   : > { %1592 = vmatprep.subr.msk.mxu0 %vm686_vm1, %v1024_v48 }
 0x21e   : > { %1593 = vmatpush3.xpose.msk.msra.mxu0 %vm686_vm1, %v1008_v49 }
 0x221   : > { %1595 = vmatmul.mubr.msk.f32.vlgmr.msra.gmra.mxu0 %vm686_vm1, %v2077_v8 }
 0x222   : > { %1596 = vmatprep.mubr.msk.f32.mxu0 %vm686_vm1, %v1041_v9 }
 0x225   : > { %1597 = vmatmul.mubr.msk.f32.gmra.mxu0 %vm686_vm1, %v1041_v9 }
 0x2e1   : > { %v1222_v28 = vpop.f32.mrf.mxu0 }
 0x2e2   : > { %v1223_v42 = vadd.f32 %v1222_v28, %v1047_v38 }
 0x2e3   : > { %v1224_v50 = vpop.f32.mrf.mxu0 }
 0x2e4   : > { %v1245_v51 = vrot.slane %v1223_v42, 4  ;;  %v1225_v52 = vadd.f32 %v1224_v50, %v1047_v38 }
 0x2e5   : > { %v1228_v14 = vpop.f32.mrf.mxu0 }
 0x2e6   : > { %v1246_v53 = vmax.f32 %v1223_v42, %v1245_v51  ;;  %v1253_v54 = vrot.slane %v1225_v52, 4  ;;  %v1229_v44 = vadd.f32 %v1228_v14, %v1052_v43 }
 0x2e7   : > { %v1230_v16 = vpop.f32.mrf.mxu0 }
 0x2e8   : > { %v1247_v55 = vrot.slane %v1246_v53, 2  ;;  %v1254_v56 = vmax.f32 %v1225_v52, %v1253_v54  ;;  %v1231_v47 = vadd.f32 %v1230_v16, %v1052_v43 }
 0x2ea   : > { %v1248_v57 = vmax.f32 %v1246_v53, %v1247_v55  ;;  %v1255_v58 = vrot.slane %v1254_v56, 2 }
 0x2ec   : > { %v1249_v59 = vrot.slane %v1248_v57, 1  ;;  %v1256_v60 = vmax.f32 %v1254_v56, %v1255_v58 }
 0x2ee   : > { %v1250_v61 = vmax.f32 %v1248_v57, %v1249_v59  ;;  %v1257_v8 = vrot.slane %v1256_v60, 1 }
 0x2f0   : > { %v1259_v62 = vsub.f32 %v1223_v42, %v1250_v61  ;;  %v1261_v63 = vsub.f32 -inf, %v1250_v61  ;;  %v1258_v0 = vmax.f32 %v1256_v60, %v1257_v8 }
 0x2f2   : > { %v1263_v1 = vmul.f32 1.442695, %v1259_v62  ;;  %v1267_v2 = vmul.f32 1.442695, %v1261_v63  ;;  %v1260_v3 = vsub.f32 %v1225_v52, %v1258_v0  ;;  %v1262_v4 = vsub.f32 -inf, %v1258_v0 }
 0x2f4   : > { %1750 = vpow2.f32 %v1263_v1  ;;  %v1265_v5 = vmul.f32 1.442695, %v1260_v3  ;;  %v1269_v6 = vmul.f32 1.442695, %v1262_v4 }
 0x2f5   : > { %1752 = vpow2.f32 %v1267_v2 }
 0x2f6   : > { %1754 = vpow2.f32 %v1265_v5 }
 0x2f7   : > { %1756 = vpow2.f32 %v1269_v6 }
 0x301   : > { %v1751_v7 = vpop.eup %1750 }
 0x302   : > { %v1753_v11 = vpop.eup %1752 }
 0x303   : > { %v1755_v13 = vpop.eup %1754  ;;  %v1271_v15 = vsel %vm1242_vm2, %v1753_v11, 0.0 }
 0x304   : > { %v1757_v21 = vpop.eup %1756  ;;  %v1272_v22 = vadd.f32 %v1751_v7, %v1271_v15 }
 0x305   : > { %v1279_v19 = vsel %vm1242_vm2, %v1757_v21, 0.0 }
 0x306   : > { %v1273_v23 = vrot.slane %v1272_v22, 4  ;;  %v1280_v24 = vadd.f32 %v1755_v13, %v1279_v19 }
 0x308   : > { %v1274_v25 = vadd.f32 %v1273_v23, %v1272_v22  ;;  %v1281_v26 = vrot.slane %v1280_v24, 4 }
 0x30a   : > { %v1275_v20 = vrot.slane %v1274_v25, 2  ;;  %v1282_v33 = vadd.f32 %v1281_v26, %v1280_v24 }
 0x30c   : > { %v1276_v35 = vadd.f32 %v1275_v20, %v1274_v25  ;;  %v1283_v17 = vrot.slane %v1282_v33, 2 }
 0x30e   : > { %v1277_v34 = vrot.slane %v1276_v35, 1  ;;  %v1284_v36 = vadd.f32 %v1283_v17, %v1282_v33 }
 0x310   : > { %v1278_v37 = vadd.f32 %v1277_v34, %v1276_v35  ;;  %v1285_v18 = vrot.slane %v1284_v36, 1 }
 0x312   : > { %1758 = vrcp.f32 %v1278_v37  ;;  %v1286_v31 = vadd.f32 %v1285_v18, %v1284_v36 }
 0x314   : > { %1760 = vrcp.f32 %v1286_v31 }
 0x31f   : > { %v1759_v41 = vpop.eup %1758 }
 0x320   : > { %v1288_v29 = vmul.f32 %v1759_v41, %v1751_v7  ;;  %v1291_v45 = vmul.f32 %v1759_v41, %v1753_v11 }
 0x321   : > { %v1761_v10 = vpop.eup %1760 }
 0x322   : > { %v1290_v30 = vmul.f32 %v1761_v10, %v1755_v13  ;;  %v1297_v46 = vsel %vm1294_vm3, %v1229_v44, %v1291_v45  ;;  %1299 = vst [vmem:[%s272_s16] sm:$0xff] %v1288_v29  ;;  %v1292_v12 = vmul.f32 %v1761_v10, %v1757_v21 }
 0x323   : > { %1301 = vst [vmem:[%s272_s16 + $0x10] sm:$0x1] %v1297_v46 }
 0x324   : > { %1300 = vst [vmem:[%s272_s16 + $0x8] sm:$0xff] %v1290_v30  ;;  %v1298_v27 = vsel %vm1294_vm3, %v1231_v47, %v1292_v12 }
 0x325   : > { %1302 = vst [vmem:[%s272_s16 + $0x18] sm:$0x1] %v1298_v27 }
 0x326   : > { %1775 = shalt.err (!%p1772_p3)
}
 0x327   : > { %s1776_s9 = scalar_lea.hbm %s2216_s28, 512  ;;  %s1780_s15 = scalar_lea.hbm %s2266_s7, 1024 }
 0x328   : > { %p1777_p4 = scmp.ne.s32.totalorder %s2216_s28, %s1776_s9  ;;  %p1781_p9 = scmp.lt.s32.totalorder %s2216_s28, %s2266_s7 }
 0x329   : > { %p1782_p10 = scmp.lt.s32.totalorder %s1780_s15, %s1776_s9 }
 0x32a   : > { %p1778_p7 = pnand %p1777_p4, %p1907_p5 }
 0x32b   : > { %p1783_p11 = por %p1782_p10, %p1781_p9 }
 0x32c   : > { %p1779_p8 = pneg %p1778_p7 }
 0x32e   : > { %p1784_p12 = pnand %p1783_p11, %p1779_p8 }
 0x330   : > { %1787 = shalt.err (!%p1784_p12)
}
 0x331   : > { %s1826_s19 = smov 256   ;;  %s1827_s20 = smov 512  }
 0x332   : > { %s1828_s22 = smov 16  }
 0x333   : > { %1706 = dma.vmem_to_hbm [thread:$0]  (%p1907_p5), %s2210_s17, 512, %s2216_s28, %s2219_s21, %s1826_s19, %s1827_s20, %s1828_s22  }
 0x334 PF: > { %p1712_p13 = scmp.ge.s32.totalorder %s1822_s27, 2  ;;  %s1332_s23 = sand.u32 1, %s1810_s24  }
 0x335   : > { %s1333_s29 = scalar_lea.sflag [#allocation3], %s1332_s23 }
 0x336   : > { %p1709_p0 = pnand %p1712_p13, %p1911_p6 }
 0x338   : > { %p1710_p1 = pneg %p1709_p0 }
 0x33a   : > { %1805 = dma.done.wait (%p1710_p1), %s1333_s29, 512  }
 0x33b   : > { %1807 = vsyncadd (%p1710_p1), %s1333_s29, 4294966784  ;;  %p17_p2 = scmp.ge.s32.totalorder %s1894_s30, 4   ;;  %s2269_s24 = smov %s1814_s25 }
 0x33c   : > { %s2270_s25 = smov %s1818_s26  ;;  %s2271_s26 = smov %s1905_s10 }
 0x33d   : > { %s2272_s27 = smov %s1894_s30  ;;  %19 = sbr.rel (!%p17_p2) target bundleno = 3 (0x3), region = 83 }
 0x342   :  { %1338 = vsyncpa [#allocation3], 1 }
 0x343   :  { %1340 = vsyncpa [#allocation3 + $0x1], 1 }

</bundles_post_ra>
